<compile_context>
chip_gen: v7x
topology: tpu7x:2x2x1
jax: 0.10.0
libtpu: 0.0.40
codegen_flags: <defaults>
</compile_context>

<pallas_src>
import jax
import jax.numpy as jnp
from jax.experimental import pallas as pl
from jax.experimental.pallas import tpu as pltpu


def _round_up(n, m):
    return ((n + m - 1) // m) * m


def _regressor_kernel(x_ref,
                      w1_ref, b1_ref,
                      w2_ref, b2_ref,
                      w3_ref, b3_ref,
                      w4_ref, b4_ref,
                      out_ref, latent_ref):
    # Layer 1: Linear(in_pad, 256) + ReLU   (Dropout(0.2) == identity in eval mode)
    h = jnp.dot(x_ref[...], w1_ref[...], preferred_element_type=jnp.float32) + b1_ref[...]
    h = jnp.maximum(h, 0.0)

    # Layer 2: Linear(256, 512) + ReLU
    h = jnp.dot(h.astype(jnp.bfloat16), w2_ref[...],
                preferred_element_type=jnp.float32) + b2_ref[...]
    h = jnp.maximum(h, 0.0)

    # Layer 3: Linear(512, 512) + ReLU
    h = jnp.dot(h.astype(jnp.bfloat16), w3_ref[...],
                preferred_element_type=jnp.float32) + b3_ref[...]
    h = jnp.maximum(h, 0.0)

    # Layer 4: Linear(512, out_pad) + Tanh
    o = jnp.dot(h.astype(jnp.bfloat16), w4_ref[...],
                preferred_element_type=jnp.float32) + b4_ref[...]
    o = jnp.tanh(o)

    latent_ref[...] = o.astype(latent_ref.dtype)
    out_ref[...] = (2.0 * o).astype(out_ref.dtype)


def basic_regressor_forward(x, params, *, tm=512):
    """Full MLP in one pallas_call; batch is gridded, weights stay VMEM-resident."""
    B, in_dim = x.shape
    h1 = params["w1"].shape[1]          # 256
    h2 = params["w2"].shape[1]          # 512
    h3 = params["w3"].shape[1]          # 512
    out_dim = params["w4"].shape[1]

    in_pad = _round_up(max(in_dim, 128), 128)
    out_pad = _round_up(max(out_dim, 128), 128)

    # Batch tile: multiple of 8 sublanes, capped by tm and by the (padded) batch.
    tm = max(8, min(tm, _round_up(B, 8)))
    b_pad = _round_up(B, tm)

    # Zero-pad x to (b_pad, in_pad) and cast to bf16 for the MXU.
    xp = jnp.zeros((b_pad, in_pad), jnp.bfloat16).at[:B, :in_dim].set(
        x.astype(jnp.bfloat16))

    # Weights -> bf16 (halves HBM traffic); biases stay f32. Zero-pad layer-1 K and
    # layer-4 N so all lane dims are multiples of 128 (zero rows/cols are inert).
    w1 = jnp.zeros((in_pad, h1), jnp.bfloat16).at[:in_dim, :].set(
        params["w1"].astype(jnp.bfloat16))
    w2 = params["w2"].astype(jnp.bfloat16)
    w3 = params["w3"].astype(jnp.bfloat16)
    w4 = jnp.zeros((h3, out_pad), jnp.bfloat16).at[:, :out_dim].set(
        params["w4"].astype(jnp.bfloat16))
    b1 = params["b1"].astype(jnp.float32)
    b2 = params["b2"].astype(jnp.float32)
    b3 = params["b3"].astype(jnp.float32)
    b4 = jnp.zeros((1, out_pad), jnp.float32).at[:, :out_dim].set(
        params["b4"].astype(jnp.float32))

    grid = (b_pad // tm,)

    def _tile(i):        # batch-tiled operands
        return (i, 0)

    def _resident(i):    # weights/biases: same block every step -> stay in VMEM
        return (0, 0)

    in_specs = [
        pl.BlockSpec((tm, in_pad), _tile),
        pl.BlockSpec(w1.shape, _resident), pl.BlockSpec(b1.shape, _resident),
        pl.BlockSpec(w2.shape, _resident), pl.BlockSpec(b2.shape, _resident),
        pl.BlockSpec(w3.shape, _resident), pl.BlockSpec(b3.shape, _resident),
        pl.BlockSpec(w4.shape, _resident), pl.BlockSpec(b4.shape, _resident),
    ]
    out_specs = (
        pl.BlockSpec((tm, out_pad), _tile),
        pl.BlockSpec((tm, out_pad), _tile),
    )

    flops = 2 * b_pad * (in_pad * h1 + h1 * h2 + h2 * h3 + h3 * out_pad)
    bytes_accessed = (
        xp.size * 2
        + (w1.size + w2.size + w3.size + w4.size) * 2
        + (b1.size + b2.size + b3.size + b4.size) * 4
        + 2 * b_pad * out_pad * 4)
    cost = pl.CostEstimate(flops=flops,
                           transcendentals=b_pad * out_pad,
                           bytes_accessed=bytes_accessed)

    out_p, latent_p = pl.pallas_call(
        _regressor_kernel,
        grid=grid,
        in_specs=in_specs,
        out_specs=out_specs,
        out_shape=(
            jax.ShapeDtypeStruct((b_pad, out_pad), jnp.float32),
            jax.ShapeDtypeStruct((b_pad, out_pad), jnp.float32),
        ),
        compiler_params=pltpu.CompilerParams(
            dimension_semantics=("parallel",)),
        cost_estimate=cost,
    )(xp, w1, b1, w2, b2, w3, b3, w4, b4)

    return {"output": out_p[:B, :out_dim], "latent": latent_p[:B, :out_dim]}


def init_params(key, input_dim, output_dim):
    """Deterministic synthetic parameters matching nn.Linear shapes (stored transposed)."""
    dims = [(input_dim, 256), (256, 512), (512, 512), (512, output_dim)]
    params = {}
    for i, (fan_in, fan_out) in enumerate(dims, start=1):
        key, kw, kb = jax.random.split(key, 3)
        bound = 1.0 / jnp.sqrt(fan_in)
        params[f"w{i}"] = jax.random.uniform(
            kw, (fan_in, fan_out), jnp.float32, -bound, bound)
        params[f"b{i}"] = jax.random.uniform(
            kb, (1, fan_out), jnp.float32, -bound, bound)
    return params


if __name__ == "__main__":
    key = jax.random.PRNGKey(0)
    k_x, k_p = jax.random.split(key)

    batch, input_dim, output_dim = 8, 32, 8
    x = jax.random.normal(k_x, (batch, input_dim), jnp.float32)
    params = init_params(k_p, input_dim, output_dim)

    result = jax.block_until_ready(basic_regressor_forward(x, params))

    # Pure-JAX reference with the same bf16 weight/activation casts
    # (eval-mode dropout == identity).
    wb = {k: (v.astype(jnp.bfloat16) if k.startswith("w") else v)
          for k, v in params.items()}
    h = jnp.maximum(jnp.dot(x.astype(jnp.bfloat16), wb["w1"],
                            preferred_element_type=jnp.float32) + wb["b1"], 0.0)
    h = jnp.maximum(jnp.dot(h.astype(jnp.bfloat16), wb["w2"],
                            preferred_element_type=jnp.float32) + wb["b2"], 0.0)
    h = jnp.maximum(jnp.dot(h.astype(jnp.bfloat16), wb["w3"],
                            preferred_element_type=jnp.float32) + wb["b3"], 0.0)
    o_ref = jnp.tanh(jnp.dot(h.astype(jnp.bfloat16), wb["w4"],
                             preferred_element_type=jnp.float32) + wb["b4"])

    assert result["latent"].shape == (batch, output_dim)
    assert result["output"].shape == (batch, output_dim)
    assert jnp.allclose(result["latent"], o_ref, atol=1e-2, rtol=1e-2)
    assert jnp.allclose(result["output"], 2.0 * o_ref, atol=2e-2, rtol=1e-2)

    print("KERNEL_OK")
</pallas_src>

<mosaic_0001>
module attributes {stable_mosaic.version = 11 : i64} {
  func.func @_regressor_kernel(%arg0: i32, %arg1: memref<8x128xbf16, #tpu.memory_space<vmem>>, %arg2: memref<128x256xbf16, #tpu.memory_space<vmem>>, %arg3: memref<1x256xf32, #tpu.memory_space<vmem>>, %arg4: memref<256x512xbf16, #tpu.memory_space<vmem>>, %arg5: memref<1x512xf32, #tpu.memory_space<vmem>>, %arg6: memref<512x512xbf16, #tpu.memory_space<vmem>>, %arg7: memref<1x512xf32, #tpu.memory_space<vmem>>, %arg8: memref<512x128xbf16, #tpu.memory_space<vmem>>, %arg9: memref<1x128xf32, #tpu.memory_space<vmem>>, %arg10: memref<8x128xf32, #tpu.memory_space<vmem>>, %arg11: memref<8x128xf32, #tpu.memory_space<vmem>>) attributes {dimension_semantics = [#tpu.dimension_semantics<parallel>], iteration_bounds = array<i64: 1>, scalar_prefetch = 0 : i64, scratch_operands = 0 : i64, tpu.core_type = #tpu.core_type<tc>, window_params = [{transform_indices = @transform_0, window_bounds = array<i64: 8, 128>}, {pipeline_mode = #tpu.pipeline_mode<synchronous>, transform_indices = @transform_1, window_bounds = array<i64: 128, 256>}, {pipeline_mode = #tpu.pipeline_mode<synchronous>, transform_indices = @transform_2, window_bounds = array<i64: 1, 256>}, {pipeline_mode = #tpu.pipeline_mode<synchronous>, transform_indices = @transform_3, window_bounds = array<i64: 256, 512>}, {pipeline_mode = #tpu.pipeline_mode<synchronous>, transform_indices = @transform_4, window_bounds = array<i64: 1, 512>}, {pipeline_mode = #tpu.pipeline_mode<synchronous>, transform_indices = @transform_5, window_bounds = array<i64: 512, 512>}, {pipeline_mode = #tpu.pipeline_mode<synchronous>, transform_indices = @transform_6, window_bounds = array<i64: 1, 512>}, {pipeline_mode = #tpu.pipeline_mode<synchronous>, transform_indices = @transform_7, window_bounds = array<i64: 512, 128>}, {pipeline_mode = #tpu.pipeline_mode<synchronous>, transform_indices = @transform_8, window_bounds = array<i64: 1, 128>}, {transform_indices = @transform_9, window_bounds = array<i64: 8, 128>}, {transform_indices = @transform_10, window_bounds = array<i64: 8, 128>}]} {
    %c0 = arith.constant 0 : index
    %c0_0 = arith.constant 0 : index
    %0 = vector.load %arg1[%c0, %c0_0] : memref<8x128xbf16, #tpu.memory_space<vmem>>, vector<8x128xbf16>
    %c0_1 = arith.constant 0 : index
    %c0_2 = arith.constant 0 : index
    %1 = vector.load %arg2[%c0_1, %c0_2] : memref<128x256xbf16, #tpu.memory_space<vmem>>, vector<128x256xbf16>
    %cst = arith.constant dense<0.000000e+00> : vector<8x256xf32>
    %2 = tpu.matmul %0, %1, %cst {dimension_numbers = #tpu.dot_dimension_numbers<[1], [0], [0], [1], [0, 0, 1, 1], [], []>} : vector<8x128xbf16>, vector<128x256xbf16>, vector<8x256xf32> -> vector<8x256xf32>
    %c0_3 = arith.constant 0 : index
    %c0_4 = arith.constant 0 : index
    %3 = vector.load %arg3[%c0_3, %c0_4] : memref<1x256xf32, #tpu.memory_space<vmem>>, vector<1x256xf32>
    %4 = vector.broadcast %3 : vector<1x256xf32> to vector<8x256xf32>
    %5 = arith.addf %2, %4 : vector<8x256xf32>
    %cst_5 = arith.constant 0.000000e+00 : f32
    %6 = vector.broadcast %cst_5 : f32 to vector<8x256xf32>
    %7 = arith.maximumf %5, %6 : vector<8x256xf32>
    %8 = arith.truncf %7 : vector<8x256xf32> to vector<8x256xbf16>
    %c0_6 = arith.constant 0 : index
    %c0_7 = arith.constant 0 : index
    %9 = vector.load %arg4[%c0_6, %c0_7] : memref<256x512xbf16, #tpu.memory_space<vmem>>, vector<256x512xbf16>
    %cst_8 = arith.constant dense<0.000000e+00> : vector<8x512xf32>
    %10 = tpu.matmul %8, %9, %cst_8 {dimension_numbers = #tpu.dot_dimension_numbers<[1], [0], [0], [1], [0, 0, 1, 1], [], []>} : vector<8x256xbf16>, vector<256x512xbf16>, vector<8x512xf32> -> vector<8x512xf32>
    %c0_9 = arith.constant 0 : index
    %c0_10 = arith.constant 0 : index
    %11 = vector.load %arg5[%c0_9, %c0_10] : memref<1x512xf32, #tpu.memory_space<vmem>>, vector<1x512xf32>
    %12 = vector.broadcast %11 : vector<1x512xf32> to vector<8x512xf32>
    %13 = arith.addf %10, %12 : vector<8x512xf32>
    %cst_11 = arith.constant 0.000000e+00 : f32
    %14 = vector.broadcast %cst_11 : f32 to vector<8x512xf32>
    %15 = arith.maximumf %13, %14 : vector<8x512xf32>
    %16 = arith.truncf %15 : vector<8x512xf32> to vector<8x512xbf16>
    %c0_12 = arith.constant 0 : index
    %c0_13 = arith.constant 0 : index
    %17 = vector.load %arg6[%c0_12, %c0_13] : memref<512x512xbf16, #tpu.memory_space<vmem>>, vector<512x512xbf16>
    %cst_14 = arith.constant dense<0.000000e+00> : vector<8x512xf32>
    %18 = tpu.matmul %16, %17, %cst_14 {dimension_numbers = #tpu.dot_dimension_numbers<[1], [0], [0], [1], [0, 0, 1, 1], [], []>} : vector<8x512xbf16>, vector<512x512xbf16>, vector<8x512xf32> -> vector<8x512xf32>
    %c0_15 = arith.constant 0 : index
    %c0_16 = arith.constant 0 : index
    %19 = vector.load %arg7[%c0_15, %c0_16] : memref<1x512xf32, #tpu.memory_space<vmem>>, vector<1x512xf32>
    %20 = vector.broadcast %19 : vector<1x512xf32> to vector<8x512xf32>
    %21 = arith.addf %18, %20 : vector<8x512xf32>
    %cst_17 = arith.constant 0.000000e+00 : f32
    %22 = vector.broadcast %cst_17 : f32 to vector<8x512xf32>
    %23 = arith.maximumf %21, %22 : vector<8x512xf32>
    %24 = arith.truncf %23 : vector<8x512xf32> to vector<8x512xbf16>
    %c0_18 = arith.constant 0 : index
    %c0_19 = arith.constant 0 : index
    %25 = vector.load %arg8[%c0_18, %c0_19] : memref<512x128xbf16, #tpu.memory_space<vmem>>, vector<512x128xbf16>
    %cst_20 = arith.constant dense<0.000000e+00> : vector<8x128xf32>
    %26 = tpu.matmul %24, %25, %cst_20 {dimension_numbers = #tpu.dot_dimension_numbers<[1], [0], [0], [1], [0, 0, 1, 1], [], []>} : vector<8x512xbf16>, vector<512x128xbf16>, vector<8x128xf32> -> vector<8x128xf32>
    %c0_21 = arith.constant 0 : index
    %c0_22 = arith.constant 0 : index
    %27 = vector.load %arg9[%c0_21, %c0_22] : memref<1x128xf32, #tpu.memory_space<vmem>>, vector<1x128xf32>
    %28 = vector.broadcast %27 : vector<1x128xf32> to vector<8x128xf32>
    %29 = arith.addf %26, %28 : vector<8x128xf32>
    %30 = math.tanh %29 : vector<8x128xf32>
    %c0_23 = arith.constant 0 : index
    %c0_24 = arith.constant 0 : index
    %31 = vector.load %arg11[%c0_23, %c0_24] : memref<8x128xf32, #tpu.memory_space<vmem>>, vector<8x128xf32>
    tpu.vector_store %arg11[%c0_23, %c0_24], %30 {strides = array<i32>} : memref<8x128xf32, #tpu.memory_space<vmem>>, vector<8x128xf32>,
    %cst_25 = arith.constant 2.000000e+00 : f32
    %32 = vector.broadcast %cst_25 : f32 to vector<8x128xf32>
    %33 = arith.mulf %32, %30 : vector<8x128xf32>
    %c0_26 = arith.constant 0 : index
    %c0_27 = arith.constant 0 : index
    %34 = vector.load %arg10[%c0_26, %c0_27] : memref<8x128xf32, #tpu.memory_space<vmem>>, vector<8x128xf32>
    tpu.vector_store %arg10[%c0_26, %c0_27], %33 {strides = array<i32>} : memref<8x128xf32, #tpu.memory_space<vmem>>, vector<8x128xf32>,
    return
  }
  func.func @transform_0(%arg0: i32) -> (i32, i32) {
    %c0_i32 = arith.constant 0 : i32
    %c0_i32_0 = arith.constant 0 : i32
    return %arg0, %c0_i32 : i32, i32
  }
  func.func @transform_1(%arg0: i32) -> (i32, i32) {
    %c0_i32 = arith.constant 0 : i32
    %c0_i32_0 = arith.constant 0 : i32
    %c0_i32_1 = arith.constant 0 : i32
    return %c0_i32, %c0_i32_0 : i32, i32
  }
  func.func @transform_2(%arg0: i32) -> (i32, i32) {
    %c0_i32 = arith.constant 0 : i32
    %c0_i32_0 = arith.constant 0 : i32
    %c0_i32_1 = arith.constant 0 : i32
    return %c0_i32, %c0_i32_0 : i32, i32
  }
  func.func @transform_3(%arg0: i32) -> (i32, i32) {
    %c0_i32 = arith.constant 0 : i32
    %c0_i32_0 = arith.constant 0 : i32
    %c0_i32_1 = arith.constant 0 : i32
    return %c0_i32, %c0_i32_0 : i32, i32
  }
  func.func @transform_4(%arg0: i32) -> (i32, i32) {
    %c0_i32 = arith.constant 0 : i32
    %c0_i32_0 = arith.constant 0 : i32
    %c0_i32_1 = arith.constant 0 : i32
    return %c0_i32, %c0_i32_0 : i32, i32
  }
  func.func @transform_5(%arg0: i32) -> (i32, i32) {
    %c0_i32 = arith.constant 0 : i32
    %c0_i32_0 = arith.constant 0 : i32
    %c0_i32_1 = arith.constant 0 : i32
    return %c0_i32, %c0_i32_0 : i32, i32
  }
  func.func @transform_6(%arg0: i32) -> (i32, i32) {
    %c0_i32 = arith.constant 0 : i32
    %c0_i32_0 = arith.constant 0 : i32
    %c0_i32_1 = arith.constant 0 : i32
    return %c0_i32, %c0_i32_0 : i32, i32
  }
  func.func @transform_7(%arg0: i32) -> (i32, i32) {
    %c0_i32 = arith.constant 0 : i32
    %c0_i32_0 = arith.constant 0 : i32
    %c0_i32_1 = arith.constant 0 : i32
    return %c0_i32, %c0_i32_0 : i32, i32
  }
  func.func @transform_8(%arg0: i32) -> (i32, i32) {
    %c0_i32 = arith.constant 0 : i32
    %c0_i32_0 = arith.constant 0 : i32
    %c0_i32_1 = arith.constant 0 : i32
    return %c0_i32, %c0_i32_0 : i32, i32
  }
  func.func @transform_9(%arg0: i32) -> (i32, i32) {
    %c0_i32 = arith.constant 0 : i32
    %c0_i32_0 = arith.constant 0 : i32
    return %arg0, %c0_i32 : i32, i32
  }
  func.func @transform_10(%arg0: i32) -> (i32, i32) {
    %c0_i32 = arith.constant 0 : i32
    %c0_i32_0 = arith.constant 0 : i32
    return %arg0, %c0_i32 : i32, i32
  }
}

</mosaic_0001>

<bundles_post_ra>
// kernel: tpu_custom_call.1
= control target key start
LH: loop header
LB: loop body
LE: loop exit
PB: predicated region body
PF: predicated region fallthrough
CT: control target
= control target key end

     0   :  { %16 = vsyncpa [#allocation3], 0  ;;  %s3118_s0 = inlined_call_operand.hbm [shape: bf16[8,128], index: 0, kind: input, shape index: {}]   ;;  %s3119_s1 = inlined_call_operand.hbm [shape: bf16[128,256], index: 1, kind: input, shape index: {}]   ;;  %s3120_s2 = inlined_call_operand.vmem [shape: f32[1,256], index: 2, kind: input, shape index: {}]   ;;  %s3121_s3 = inlined_call_operand.hbm [shape: bf16[256,512], index: 3, kind: input, shape index: {}]   ;;  %s3122_s4 = inlined_call_operand.vmem [shape: f32[1,512], index: 4, kind: input, shape index: {}]   ;;  %s3123_s5 = inlined_call_operand.hbm [shape: bf16[512,512], index: 5, kind: input, shape index: {}]   ;;  %s3124_s6 = inlined_call_operand.vmem [shape: f32[1,512], index: 6, kind: input, shape index: {}]   ;;  %s3125_s7 = inlined_call_operand.hbm [shape: bf16[512,128], index: 7, kind: input, shape index: {}]   ;;  %s3126_s8 = inlined_call_operand.vmem [shape: f32[1,128], index: 8, kind: input, shape index: {}]   ;;  %s3127_s9 = inlined_call_operand.hbm [shape: f32[8,128], index: 9, kind: output, shape index: {0}]   ;;  %s3128_s10 = inlined_call_operand.hbm [shape: f32[8,128], index: 10, kind: output, shape index: {1}]  }
   0x1   :  { %17 = vsyncpa [#allocation6], 0 }
   0x2   :  { %18 = vsyncpa [#allocation9], 0 }
   0x3   :  { %19 = vsyncpa [#allocation4], 0 }
   0x4   :  { %20 = vsyncpa [#allocation13], 0  ;;  %s2914_s13 = smov [#allocation5]   ;;  %s2750_s17 = scalar_lea.hbm %s3119_s1, 2048 }
   0x5   :  { %s36_s14 = sshll.u32 %s2914_s13, 4  ;;  %p2751_p0 = scmp.ne.s32.totalorder %s3119_s1, %s2750_s17  ;;  %s37_s14 = int_to_ptr.vmem [resolvable:$true] %s36_s14 }
   0x6   :  { %p2754_p1 = scmp.lt.u32.totalorder %s2750_s17, %s3119_s1 }
   0x8   :  { %p2756_p2 = pnand %p2754_p1, %p2751_p0 }
   0xa   :  { %2759 = shalt.err (!%p2756_p2)
}
   0xb   :  { %s2760_s22 = scalar_lea.vmem %s37_s14, 2048  ;;  %p2765_p4 = scmp.lt.s32.totalorder %s37_s14, %s37_s14 }
   0xc   :  { %p2761_p3 = scmp.ne.s32.totalorder %s37_s14, %s2760_s22  ;;  %p2766_p5 = scmp.lt.s32.totalorder %s2760_s22, %s2760_s22 }
   0xe   :  { %p2767_p6 = por %p2766_p5, %p2765_p4 }
  0x10   :  { %p2768_p7 = pnand %p2767_p6, %p2761_p3 }
  0x12   :  { %2771 = shalt.err (!%p2768_p7)
}
  0x13   :  { %s2915_s23 = smov 128   ;;  %s2916_s24 = smov 8  }
  0x14   :  { %42 = dma.hbm_to_vmem [thread:$0]  %s3119_s1, 2048, %s37_s14, [#allocation6], %s2915_s23, %s2915_s23, %s2916_s24  }
  0x15   :  { %s2917_s27 = smov [#allocation8]   ;;  %s2918_s29 = smov [#allocation2]  }
  0x16   :  { %s64_s28 = sshll.u32 %s2917_s27, 4  ;;  %s27_s30 = sshll.u32 %s2918_s29, 4  ;;  %s65_s28 = int_to_ptr.vmem [resolvable:$true] %s64_s28  ;;  %s28_s30 = int_to_ptr.vmem [resolvable:$true] %s27_s30 }
  0x17   :  { %s2772_s13 = scalar_lea.hbm %s3123_s5, 16384 }
  0x18   :  { %p2773_p8 = scmp.ne.s32.totalorder %s3123_s5, %s2772_s13  ;;  %p2776_p9 = scmp.lt.u32.totalorder %s2772_s13, %s3123_s5 }
  0x1a   :  { %p2778_p10 = pnand %p2776_p9, %p2773_p8 }
  0x1c   :  { %2781 = shalt.err (!%p2778_p10)
}
  0x1d   :  { %s2782_s1 = scalar_lea.vmem %s65_s28, 16384  ;;  %p2787_p12 = scmp.lt.s32.totalorder %s65_s28, %s65_s28 }
  0x1e   :  { %p2783_p11 = scmp.ne.s32.totalorder %s65_s28, %s2782_s1  ;;  %p2788_p13 = scmp.lt.s32.totalorder %s2782_s1, %s2782_s1 }
  0x20   :  { %p2789_p0 = por %p2788_p13, %p2787_p12 }
  0x22   :  { %p2790_p1 = pnand %p2789_p0, %p2783_p11 }
  0x24   :  { %2793 = shalt.err (!%p2790_p1)
}
  0x25   :  { %s2919_s14 = smov 256   ;;  %s2920_s19 = smov 16  }
  0x26   :  { %70 = dma.hbm_to_vmem [thread:$0]  %s3123_s5, 16384, %s65_s28, [#allocation9], %s2919_s14, %s2919_s14, %s2920_s19  }
  0x27   :  { %s2794_s24 = scalar_lea.hbm %s3118_s0, 64 }
  0x28   :  { %p2795_p2 = scmp.ne.s32.totalorder %s3118_s0, %s2794_s24  ;;  %p2798_p3 = scmp.lt.u32.totalorder %s2794_s24, %s3118_s0 }
  0x2a   :  { %p2800_p4 = pnand %p2798_p3, %p2795_p2 }
  0x2c   :  { %2803 = shalt.err (!%p2800_p4)
}
  0x2d   :  { %s2804_s11 = scalar_lea.vmem %s28_s30, 64  ;;  %p2809_p6 = scmp.lt.s32.totalorder %s28_s30, %s28_s30 }
  0x2e   :  { %p2805_p5 = scmp.ne.s32.totalorder %s28_s30, %s2804_s11  ;;  %p2810_p7 = scmp.lt.s32.totalorder %s2804_s11, %s2804_s11 }
  0x30   :  { %p2811_p8 = por %p2810_p7, %p2809_p6 }
  0x32   :  { %p2812_p9 = pnand %p2811_p8, %p2805_p5 }
  0x34   :  { %2815 = shalt.err (!%p2812_p9)
}
  0x35   :  { %30 = dma.hbm_to_vmem [thread:$0]  %s3118_s0, 64, %s28_s30, [#allocation3]  }
  0x36   :  { %s2921_s12 = smov [#allocation7]   ;;  %s2922_s15 = smov [#allocation10]  }
  0x37   :  { %s50_s13 = sshll.u32 %s2921_s12, 4  ;;  %s78_s16 = sshll.u32 %s2922_s15, 4  ;;  %s51_s13 = int_to_ptr.vmem [resolvable:$true] %s50_s13  ;;  %s79_s16 = int_to_ptr.vmem [resolvable:$true] %s78_s16 }
  0x38   :  { %s2816_s1 = scalar_lea.hbm %s3121_s3, 8192 }
  0x39   :  { %p2817_p10 = scmp.ne.s32.totalorder %s3121_s3, %s2816_s1  ;;  %p2820_p11 = scmp.lt.u32.totalorder %s2816_s1, %s3121_s3 }
  0x3b   :  { %p2822_p12 = pnand %p2820_p11, %p2817_p10 }
  0x3d   :  { %2825 = shalt.err (!%p2822_p12)
}
  0x3e   :  { %s2826_s0 = scalar_lea.vmem %s51_s13, 8192  ;;  %p2831_p0 = scmp.lt.s32.totalorder %s51_s13, %s51_s13 }
  0x3f   :  { %p2827_p13 = scmp.ne.s32.totalorder %s51_s13, %s2826_s0  ;;  %p2832_p1 = scmp.lt.s32.totalorder %s2826_s0, %s2826_s0 }
  0x41   :  { %p2833_p2 = por %p2832_p1, %p2831_p0 }
  0x43   :  { %p2834_p3 = pnand %p2833_p2, %p2827_p13 }
  0x45   :  { %2837 = shalt.err (!%p2834_p3)
}
  0x46   :  { %56 = dma.hbm_to_vmem [thread:$0]  %s3121_s3, 8192, %s51_s13, [#allocation6], %s2919_s14, %s2919_s14, %s2920_s19  }
  0x47   :  { %s2838_s27 = scalar_lea.hbm %s3125_s7, 4096 }
  0x48   :  { %p2839_p4 = scmp.ne.s32.totalorder %s3125_s7, %s2838_s27  ;;  %p2842_p5 = scmp.lt.u32.totalorder %s2838_s27, %s3125_s7 }
  0x4a   :  { %p2844_p6 = pnand %p2842_p5, %p2839_p4 }
  0x4c   :  { %2847 = shalt.err (!%p2844_p6)
}
  0x4d   :  { %s2848_s12 = scalar_lea.vmem %s79_s16, 4096  ;;  %p2853_p8 = scmp.lt.s32.totalorder %s79_s16, %s79_s16 }
  0x4e   :  { %p2849_p7 = scmp.ne.s32.totalorder %s79_s16, %s2848_s12  ;;  %p2854_p9 = scmp.lt.s32.totalorder %s2848_s12, %s2848_s12 }
  0x50   :  { %p2855_p10 = por %p2854_p9, %p2853_p8 }
  0x52   :  { %p2856_p11 = pnand %p2855_p10, %p2849_p7 }
  0x54   :  { %2859 = shalt.err (!%p2856_p11)
}
  0x55   :  { %s2923_s3 = smov 64   ;;  %s2924_s14 = smov 4  }
  0x56   :  { %84 = dma.hbm_to_vmem [thread:$0]  %s3125_s7, 4096, %s79_s16, [#allocation9], %s2923_s3, %s2923_s3, %s2924_s14  }
  0x57   :  { %2904 = dma.done.wait [#allocation3], 64  }
  0x58   :  { %2905 = vsyncadd [#allocation3], 4294967232 }
  0x59   :  { %2906 = dma.done.wait [#allocation6], 10240  }
  0x5a   :  { %2907 = vsyncadd [#allocation6], 4294957056 }
  0x5b   :  { %2908 = dma.done.wait [#allocation9], 20480  }
  0x5c   :  { %2909 = vsyncadd [#allocation9], 4294946816  ;;  %v2925_v0 = vmov 0   ;;  %v2404_v1 = vld [vmem:[#allocation5 + $0x4] ss:$8 sps:$4 sm:$0xff]   ;;  %s2926_s1 = smov [#allocation12]  }
  0x5d   :  { %244 = vmatprep.mubr.bf16.mxu0 %v2925_v0  ;;  %v2406_v2 = vld [vmem:[#allocation5] ss:$8 sps:$4 sm:$0xff]   ;;  %212 = vmatprep.subr.bf16.mxu0 %v2404_v1  ;;  %v2407_v3 = vld [vmem:[#allocation5 + $0x14] ss:$8 sps:$4 sm:$0xff]   ;;  %v2409_v4 = vld [vmem:[#allocation5 + $0x10] ss:$8 sps:$4 sm:$0xff]  }
  0x5e   :  { %213 = vmatpush1.bf16.msra.mxu0 %v2406_v2  ;;  %v2410_v5 = vld [vmem:[#allocation5 + $0x24] ss:$8 sps:$4 sm:$0xff]   ;;  %v2412_v6 = vld [vmem:[#allocation5 + $0x20] ss:$8 sps:$4 sm:$0xff]   ;;  %v2413_v7 = vld [vmem:[#allocation5 + $0x34] ss:$8 sps:$4 sm:$0xff]  }
  0x5f   :  { %214 = vmatprep.subr.bf16.mxu0 %v2407_v3  ;;  %v2415_v8 = vld [vmem:[#allocation5 + $0x30] ss:$8 sps:$4 sm:$0xff]   ;;  %v2428_v9 = vld [vmem:[#allocation7 + $0x4] ss:$16 sps:$4 sm:$0xff]   ;;  %v2418_v13 = vld [vmem:[#allocation5 + $0x40] ss:$8 sps:$4 sm:$0xff]  }
  0x60   :  { %v2416_v10 = vld [vmem:[#allocation5 + $0x44] ss:$8 sps:$4 sm:$0xff]   ;;  %663 = vmatprep.subr.bf16.mxu1 %v2428_v9  ;;  %v2433_v11 = vld [vmem:[#allocation7] ss:$16 sps:$4 sm:$0xff]   ;;  %v2419_v14 = vld [vmem:[#allocation5 + $0x54] ss:$8 sps:$4 sm:$0xff]  }
  0x61   :  { %v2434_v12 = vld [vmem:[#allocation7 + $0x24] ss:$16 sps:$4 sm:$0xff]   ;;  %664 = vmatpush1.bf16.msra.mxu1 %v2433_v11  ;;  %v2439_v15 = vld [vmem:[#allocation7 + $0x20] ss:$16 sps:$4 sm:$0xff]   ;;  %v2432_v26 = vld [vmem:[#allocation7 + $0xc] ss:$16 sps:$4 sm:$0xff]  }
  0x62   :  { %215 = vmatpush1.bf16.msra.mxu0 %v2409_v4  ;;  %665 = vmatprep.subr.bf16.mxu1 %v2434_v12  ;;  %v2440_v16 = vld [vmem:[#allocation7 + $0x44] ss:$16 sps:$4 sm:$0xff]   ;;  %v2421_v17 = vld [vmem:[#allocation5 + $0x50] ss:$8 sps:$4 sm:$0xff]   ;;  %v2424_v21 = vld [vmem:[#allocation5 + $0x60] ss:$8 sps:$4 sm:$0xff]  }
  0x63   :  { %216 = vmatprep.subr.bf16.mxu0 %v2410_v5  ;;  %v2422_v18 = vld [vmem:[#allocation5 + $0x64] ss:$8 sps:$4 sm:$0xff]   ;;  %v2445_v19 = vld [vmem:[#allocation7 + $0x40] ss:$16 sps:$4 sm:$0xff]   ;;  %v2425_v22 = vld [vmem:[#allocation5 + $0x74] ss:$8 sps:$4 sm:$0xff]  }
  0x64   :  { %v2446_v20 = vld [vmem:[#allocation7 + $0x64] ss:$16 sps:$4 sm:$0xff]   ;;  %v2451_v23 = vld [vmem:[#allocation7 + $0x60] ss:$16 sps:$4 sm:$0xff]   ;;  %v103_v29 = vld [vmem:[#allocation2] sm:$0xf] }
  0x65   :  { %666 = vmatpush1.bf16.msra.mxu1 %v2439_v15  ;;  %v2452_v24 = vld [vmem:[#allocation7 + $0x84] ss:$16 sps:$4 sm:$0xff]   ;;  %v2427_v25 = vld [vmem:[#allocation5 + $0x70] ss:$8 sps:$4 sm:$0xff]   ;;  %v2438_v31 = vld [vmem:[#allocation7 + $0x2c] ss:$16 sps:$4 sm:$0xff]  }
  0x66   :  { %217 = vmatpush1.bf16.msra.mxu0 %v2412_v6  ;;  %667 = vmatprep.subr.bf16.mxu1 %v2440_v16  ;;  %v2457_v27 = vld [vmem:[#allocation7 + $0x80] ss:$16 sps:$4 sm:$0xff]   ;;  %v2458_v28 = vld [vmem:[#allocation7 + $0xa4] ss:$16 sps:$4 sm:$0xff]   ;;  %v2430_v30 = vld [vmem:[#allocation7 + $0x8] ss:$16 sps:$4 sm:$0xff]  }
  0x67   :  { %218 = vmatprep.subr.bf16.mxu0 %v2413_v7  ;;  %v2463_v32 = vld [vmem:[#allocation7 + $0xa0] ss:$16 sps:$4 sm:$0xff]   ;;  %v2464_v33 = vld [vmem:[#allocation7 + $0xc4] ss:$16 sps:$4 sm:$0xff]   ;;  %v2436_v34 = vld [vmem:[#allocation7 + $0x28] ss:$16 sps:$4 sm:$0xff]  }
  0x68   :  { %v2444_v35 = vld [vmem:[#allocation7 + $0x4c] ss:$16 sps:$4 sm:$0xff]   ;;  %v2469_v36 = vld [vmem:[#allocation7 + $0xc0] ss:$16 sps:$4 sm:$0xff]   ;;  %v2470_v37 = vld [vmem:[#allocation7 + $0xe4] ss:$16 sps:$4 sm:$0xff]  }
  0x69   :  { %668 = vmatpush1.bf16.msra.mxu1 %v2445_v19  ;;  %v2442_v38 = vld [vmem:[#allocation7 + $0x48] ss:$16 sps:$4 sm:$0xff]   ;;  %v2450_v39 = vld [vmem:[#allocation7 + $0x6c] ss:$16 sps:$4 sm:$0xff]   ;;  %v2475_v40 = vld [vmem:[#allocation7 + $0xe0] ss:$16 sps:$4 sm:$0xff]  }
  0x6a   :  { %219 = vmatpush1.bf16.msra.mxu0 %v2415_v8  ;;  %669 = vmatprep.subr.bf16.mxu1 %v2446_v20  ;;  %v2476_v41 = vld [vmem:[#allocation7 + $0x104] ss:$16 sps:$4 sm:$0xff]   ;;  %v2448_v42 = vld [vmem:[#allocation7 + $0x68] ss:$16 sps:$4 sm:$0xff]   ;;  %v2456_v43 = vld [vmem:[#allocation7 + $0x8c] ss:$16 sps:$4 sm:$0xff]   ;;  %v122_v20 = vlaneseq }
  0x6b   :  { %220 = vmatprep.subr.bf16.mxu0 %v2416_v10  ;;  %v2481_v44 = vld [vmem:[#allocation7 + $0x100] ss:$16 sps:$4 sm:$0xff]   ;;  %v2482_v45 = vld [vmem:[#allocation7 + $0x124] ss:$16 sps:$4 sm:$0xff]   ;;  %v2454_v46 = vld [vmem:[#allocation7 + $0x88] ss:$16 sps:$4 sm:$0xff]  }
  0x6c   :  { %v2487_v47 = vld [vmem:[#allocation7 + $0x120] ss:$16 sps:$4 sm:$0xff]   ;;  %v2462_v48 = vld [vmem:[#allocation7 + $0xac] ss:$16 sps:$4 sm:$0xff]   ;;  %v2488_v49 = vld [vmem:[#allocation7 + $0x144] ss:$16 sps:$4 sm:$0xff]  }
  0x6d   :  { %670 = vmatpush1.bf16.msra.mxu1 %v2451_v23  ;;  %v2460_v50 = vld [vmem:[#allocation7 + $0xa8] ss:$16 sps:$4 sm:$0xff]   ;;  %v2493_v51 = vld [vmem:[#allocation7 + $0x140] ss:$16 sps:$4 sm:$0xff]   ;;  %v2468_v52 = vld [vmem:[#allocation7 + $0xcc] ss:$16 sps:$4 sm:$0xff]  }
  0x6e   :  { %221 = vmatpush1.bf16.msra.mxu0 %v2418_v13  ;;  %671 = vmatprep.subr.bf16.mxu1 %v2452_v24  ;;  %v2494_v53 = vld [vmem:[#allocation7 + $0x164] ss:$16 sps:$4 sm:$0xff]   ;;  %v2466_v54 = vld [vmem:[#allocation7 + $0xc8] ss:$16 sps:$4 sm:$0xff]   ;;  %v2499_v55 = vld [vmem:[#allocation7 + $0x160] ss:$16 sps:$4 sm:$0xff]  }
  0x6f   :  { %222 = vmatprep.subr.bf16.mxu0 %v2419_v14  ;;  %v2474_v56 = vld [vmem:[#allocation7 + $0xec] ss:$16 sps:$4 sm:$0xff]   ;;  %v2500_v57 = vld [vmem:[#allocation7 + $0x184] ss:$16 sps:$4 sm:$0xff]   ;;  %v2472_v58 = vld [vmem:[#allocation7 + $0xe8] ss:$16 sps:$4 sm:$0xff]  }
  0x70   :  { %v2505_v59 = vld [vmem:[#allocation7 + $0x180] ss:$16 sps:$4 sm:$0xff]   ;;  %v2480_v60 = vld [vmem:[#allocation7 + $0x10c] ss:$16 sps:$4 sm:$0xff]   ;;  %v2506_v61 = vld [vmem:[#allocation7 + $0x1a4] ss:$16 sps:$4 sm:$0xff]  }
  0x71   :  { %672 = vmatpush1.bf16.msra.mxu1 %v2457_v27  ;;  %v2478_v62 = vld [vmem:[#allocation7 + $0x108] ss:$16 sps:$4 sm:$0xff]   ;;  %v2511_v63 = vld [vmem:[#allocation7 + $0x1a0] ss:$16 sps:$4 sm:$0xff]   ;;  %v2486_v0 = vld [vmem:[#allocation7 + $0x12c] ss:$16 sps:$4 sm:$0xff]  }
  0x72   :  { %223 = vmatpush1.bf16.msra.mxu0 %v2421_v17  ;;  %673 = vmatprep.subr.bf16.mxu1 %v2458_v28  ;;  %v2484_v1 = vld [vmem:[#allocation7 + $0x128] ss:$16 sps:$4 sm:$0xff]   ;;  %v2492_v2 = vld [vmem:[#allocation7 + $0x14c] ss:$16 sps:$4 sm:$0xff]   ;;  %v2512_v10 = vld [vmem:[#allocation7 + $0x1c4] ss:$16 sps:$4 sm:$0xff]  }
  0x73   :  { %224 = vmatprep.subr.bf16.mxu0 %v2422_v18  ;;  %v2490_v3 = vld [vmem:[#allocation7 + $0x148] ss:$16 sps:$4 sm:$0xff]   ;;  %v2498_v4 = vld [vmem:[#allocation7 + $0x16c] ss:$16 sps:$4 sm:$0xff]   ;;  %v2517_v13 = vld [vmem:[#allocation7 + $0x1c0] ss:$16 sps:$4 sm:$0xff]  }
  0x74   :  { %v2496_v5 = vld [vmem:[#allocation7 + $0x168] ss:$16 sps:$4 sm:$0xff]   ;;  %v2504_v6 = vld [vmem:[#allocation7 + $0x18c] ss:$16 sps:$4 sm:$0xff]   ;;  %v2518_v14 = vld [vmem:[#allocation7 + $0x1e4] ss:$16 sps:$4 sm:$0xff]  }
  0x75   :  { %674 = vmatpush1.bf16.msra.mxu1 %v2463_v32  ;;  %v2502_v7 = vld [vmem:[#allocation7 + $0x188] ss:$16 sps:$4 sm:$0xff]   ;;  %v2510_v8 = vld [vmem:[#allocation7 + $0x1ac] ss:$16 sps:$4 sm:$0xff]   ;;  %v2523_v17 = vld [vmem:[#allocation7 + $0x1e0] ss:$16 sps:$4 sm:$0xff]  }
  0x76   :  { %225 = vmatpush1.bf16.msra.mxu0 %v2424_v21  ;;  %675 = vmatprep.subr.bf16.mxu1 %v2464_v33  ;;  %v2508_v9 = vld [vmem:[#allocation7 + $0x1a8] ss:$16 sps:$4 sm:$0xff]   ;;  %v2516_v11 = vld [vmem:[#allocation7 + $0x1cc] ss:$16 sps:$4 sm:$0xff]   ;;  %v2526_v18 = vld [vmem:[#allocation8 + $0x4] ss:$16 sps:$4 sm:$0xff]  }
  0x77   :  { %226 = vmatprep.subr.bf16.mxu0 %v2425_v22  ;;  %v2514_v12 = vld [vmem:[#allocation7 + $0x1c8] ss:$16 sps:$4 sm:$0xff]   ;;  %v2522_v15 = vld [vmem:[#allocation7 + $0x1ec] ss:$16 sps:$4 sm:$0xff]   ;;  %v3049_v21 = vshrl.u32 %v122_v20, 7  ;;  %s2078_s20 = sshll.u32 %s2926_s1, 4  ;;  %s2079_s20 = int_to_ptr.vmem [resolvable:$true] %s2078_s20 }
  0x78   :  { %v2520_v16 = vld [vmem:[#allocation7 + $0x1e8] ss:$16 sps:$4 sm:$0xff]   ;;  %v2529_v19 = vld [vmem:[#allocation8 + $0xc] ss:$16 sps:$4 sm:$0xff]   ;;  %s2927_s21 = smov [#allocation11]   ;;  %p2865_p13 = scmp.lt.s32.totalorder %s2079_s20, %s2079_s20 }
  0x79   :  { %676 = vmatpush1.bf16.msra.mxu1 %v2469_v36  ;;  %v3052_v22 = vsub.s32 0, %v3049_v21  ;;  %v120_v23 = vld [vmem:[%s3120_s2] sm:$0x3]  ;;  %v3058_v24 = vsub.s32 1, %v3049_v21  ;;  %v2524_v36 = vld [vmem:[#allocation8] ss:$16 sps:$4 sm:$0xff]  }
  0x7a   :  { %227 = vmatpush1.bf16.msra.mxu0 %v2427_v25  ;;  %677 = vmatprep.subr.bf16.mxu1 %v2470_v37  ;;  %v2527_v37 = vld [vmem:[#allocation8 + $0x8] ss:$16 sps:$4 sm:$0xff]   ;;  %v2601_v20 = vld [vmem:[#allocation8 + $0x18c] ss:$16 sps:$4 sm:$0xff]   ;;  %s2068_s22 = sshll.u32 %s2927_s21, 4  ;;  %s2069_s22 = int_to_ptr.vmem [resolvable:$true] %s2068_s22 }
  0x7b   :  { %704 = vmatprep.subr.bf16.mxu0 %v2432_v26  ;;  %v125_v25 = vrot.slane %v120_v23, %v3052_v22  ;;  %v129_v26 = vrot.slane %v120_v23, %v3058_v24  ;;  %v2596_v23 = vld [vmem:[#allocation8 + $0x180] ss:$16 sps:$4 sm:$0xff]  }
  0x7d   :  { %245 = vmatmul.mubr.bf16.vlgmr.msra.gmra.mrb[0].mxu0 %v103_v29  ;;  %678 = vmatpush1.bf16.msra.mxu1 %v2475_v40  ;;  %v2535_v40 = vld [vmem:[#allocation8 + $0x2c] ss:$16 sps:$4 sm:$0xff]  }
  0x7e   :  { %705 = vmatpush1.bf16.msra.mxu0 %v2430_v30  ;;  %679 = vmatprep.subr.bf16.mxu1 %v2476_v41  ;;  %v2530_v41 = vld [vmem:[#allocation8 + $0x20] ss:$16 sps:$4 sm:$0xff]  }
  0x7f   :  { %706 = vmatprep.subr.bf16.mxu0 %v2438_v31 }
  0x81   :  { %680 = vmatpush1.bf16.msra.mxu1 %v2481_v44  ;;  %v2541_v44 = vld [vmem:[#allocation8 + $0x4c] ss:$16 sps:$4 sm:$0xff]  }
  0x82   :  { %707 = vmatpush1.bf16.msra.mxu0 %v2436_v34  ;;  %681 = vmatprep.subr.bf16.mxu1 %v2482_v45  ;;  %v2536_v45 = vld [vmem:[#allocation8 + $0x40] ss:$16 sps:$4 sm:$0xff]  }
  0x83   :  { %708 = vmatprep.subr.bf16.mxu0 %v2444_v35 }
  0x85   :  { %682 = vmatpush1.bf16.msra.mxu1 %v2487_v47  ;;  %v2544_v47 = vld [vmem:[#allocation8 + $0x64] ss:$16 sps:$4 sm:$0xff]  }
  0x86   :  { %709 = vmatpush1.bf16.msra.mxu0 %v2442_v38  ;;  %683 = vmatprep.subr.bf16.mxu1 %v2488_v49  ;;  %v2542_v49 = vld [vmem:[#allocation8 + $0x60] ss:$16 sps:$4 sm:$0xff]  }
  0x87   :  { %710 = vmatprep.subr.bf16.mxu0 %v2450_v39  ;;  %v2532_v39 = vld [vmem:[#allocation8 + $0x24] ss:$16 sps:$4 sm:$0xff]  }
  0x89   :  { %684 = vmatpush1.bf16.msra.mxu1 %v2493_v51  ;;  %v2550_v51 = vld [vmem:[#allocation8 + $0x84] ss:$16 sps:$4 sm:$0xff]  }
  0x8a   :  { %711 = vmatpush1.bf16.msra.mxu0 %v2448_v42  ;;  %685 = vmatprep.subr.bf16.mxu1 %v2494_v53  ;;  %v2533_v42 = vld [vmem:[#allocation8 + $0x28] ss:$16 sps:$4 sm:$0xff]   ;;  %v2548_v53 = vld [vmem:[#allocation8 + $0x80] ss:$16 sps:$4 sm:$0xff]  }
  0x8b   :  { %712 = vmatprep.subr.bf16.mxu0 %v2456_v43  ;;  %v2538_v43 = vld [vmem:[#allocation8 + $0x44] ss:$16 sps:$4 sm:$0xff]  }
  0x8d   :  { %686 = vmatpush1.bf16.msra.mxu1 %v2499_v55  ;;  %v2556_v55 = vld [vmem:[#allocation8 + $0xa4] ss:$16 sps:$4 sm:$0xff]  }
  0x8e   :  { %713 = vmatpush1.bf16.msra.mxu0 %v2454_v46  ;;  %687 = vmatprep.subr.bf16.mxu1 %v2500_v57  ;;  %v2539_v46 = vld [vmem:[#allocation8 + $0x48] ss:$16 sps:$4 sm:$0xff]   ;;  %v2554_v57 = vld [vmem:[#allocation8 + $0xa0] ss:$16 sps:$4 sm:$0xff]  }
  0x8f   :  { %714 = vmatprep.subr.bf16.mxu0 %v2462_v48  ;;  %v2547_v48 = vld [vmem:[#allocation8 + $0x6c] ss:$16 sps:$4 sm:$0xff]  }
  0x91   :  { %688 = vmatpush1.bf16.msra.mxu1 %v2505_v59  ;;  %v2562_v59 = vld [vmem:[#allocation8 + $0xc4] ss:$16 sps:$4 sm:$0xff]  }
  0x92   :  { %715 = vmatpush1.bf16.msra.mxu0 %v2460_v50  ;;  %689 = vmatprep.subr.bf16.mxu1 %v2506_v61  ;;  %v2545_v50 = vld [vmem:[#allocation8 + $0x68] ss:$16 sps:$4 sm:$0xff]   ;;  %v2560_v61 = vld [vmem:[#allocation8 + $0xc0] ss:$16 sps:$4 sm:$0xff]  }
  0x93   :  { %716 = vmatprep.subr.bf16.mxu0 %v2468_v52  ;;  %v2553_v52 = vld [vmem:[#allocation8 + $0x8c] ss:$16 sps:$4 sm:$0xff]  }
  0x95   :  { %690 = vmatpush1.bf16.msra.mxu1 %v2511_v63  ;;  %v2568_v63 = vld [vmem:[#allocation8 + $0xe4] ss:$16 sps:$4 sm:$0xff]  }
  0x96   :  { %717 = vmatpush1.bf16.msra.mxu0 %v2466_v54  ;;  %691 = vmatprep.subr.bf16.mxu1 %v2512_v10  ;;  %v2551_v54 = vld [vmem:[#allocation8 + $0x88] ss:$16 sps:$4 sm:$0xff]  }
  0x97   :  { %718 = vmatprep.subr.bf16.mxu0 %v2474_v56  ;;  %v2559_v56 = vld [vmem:[#allocation8 + $0xac] ss:$16 sps:$4 sm:$0xff]   ;;  %v2581_v10 = vld [vmem:[#allocation8 + $0x128] ss:$16 sps:$4 sm:$0xff]  }
  0x99   :  { %692 = vmatpush1.bf16.msra.mxu1 %v2517_v13  ;;  %v2584_v13 = vld [vmem:[#allocation8 + $0x140] ss:$16 sps:$4 sm:$0xff]  }
  0x9a   :  { %719 = vmatpush1.bf16.msra.mxu0 %v2472_v58  ;;  %693 = vmatprep.subr.bf16.mxu1 %v2518_v14  ;;  %v2557_v58 = vld [vmem:[#allocation8 + $0xa8] ss:$16 sps:$4 sm:$0xff]  }
  0x9b   :  { %720 = vmatprep.subr.bf16.mxu0 %v2480_v60  ;;  %v2565_v60 = vld [vmem:[#allocation8 + $0xcc] ss:$16 sps:$4 sm:$0xff]   ;;  %v2587_v14 = vld [vmem:[#allocation8 + $0x148] ss:$16 sps:$4 sm:$0xff]  }
  0x9d   :  { %694 = vmatpush1.bf16.msra.mxu1 %v2523_v17  ;;  %v2590_v17 = vld [vmem:[#allocation8 + $0x160] ss:$16 sps:$4 sm:$0xff]  }
  0x9e   :  { %721 = vmatpush1.bf16.msra.mxu0 %v2478_v62  ;;  %1543 = vmatprep.subr.bf16.mxu1 %v2526_v18  ;;  %v2563_v62 = vld [vmem:[#allocation8 + $0xc8] ss:$16 sps:$4 sm:$0xff]  }
  0x9f   :  { %722 = vmatprep.subr.bf16.mxu0 %v2486_v0  ;;  %v2571_v0 = vld [vmem:[#allocation8 + $0xec] ss:$16 sps:$4 sm:$0xff]   ;;  %v2593_v18 = vld [vmem:[#allocation8 + $0x168] ss:$16 sps:$4 sm:$0xff]  }
  0xa2   :  { %723 = vmatpush1.bf16.msra.mxu0 %v2484_v1  ;;  %v2566_v1 = vld [vmem:[#allocation8 + $0xe0] ss:$16 sps:$4 sm:$0xff]  }
  0xa3   :  { %724 = vmatprep.subr.bf16.mxu0 %v2492_v2  ;;  %v2569_v2 = vld [vmem:[#allocation8 + $0xe8] ss:$16 sps:$4 sm:$0xff]  }
  0xa6   :  { %725 = vmatpush1.bf16.msra.mxu0 %v2490_v3  ;;  %v2574_v3 = vld [vmem:[#allocation8 + $0x104] ss:$16 sps:$4 sm:$0xff]  }
  0xa7   :  { %726 = vmatprep.subr.bf16.mxu0 %v2498_v4  ;;  %v2577_v4 = vld [vmem:[#allocation8 + $0x10c] ss:$16 sps:$4 sm:$0xff]  }
  0xaa   :  { %727 = vmatpush1.bf16.msra.mxu0 %v2496_v5  ;;  %v2572_v5 = vld [vmem:[#allocation8 + $0x100] ss:$16 sps:$4 sm:$0xff]  }
  0xab   :  { %728 = vmatprep.subr.bf16.mxu0 %v2504_v6  ;;  %v2575_v6 = vld [vmem:[#allocation8 + $0x108] ss:$16 sps:$4 sm:$0xff]  }
  0xae   :  { %729 = vmatpush1.bf16.msra.mxu0 %v2502_v7  ;;  %v2580_v7 = vld [vmem:[#allocation8 + $0x124] ss:$16 sps:$4 sm:$0xff]  }
  0xaf   :  { %730 = vmatprep.subr.bf16.mxu0 %v2510_v8  ;;  %v2583_v8 = vld [vmem:[#allocation8 + $0x12c] ss:$16 sps:$4 sm:$0xff]  }
  0xb2   :  { %731 = vmatpush1.bf16.msra.mxu0 %v2508_v9  ;;  %v2578_v9 = vld [vmem:[#allocation8 + $0x120] ss:$16 sps:$4 sm:$0xff]  }
  0xb3   :  { %732 = vmatprep.subr.bf16.mxu0 %v2516_v11  ;;  %v2586_v11 = vld [vmem:[#allocation8 + $0x144] ss:$16 sps:$4 sm:$0xff]  }
  0xb6   :  { %733 = vmatpush1.bf16.msra.mxu0 %v2514_v12  ;;  %v2589_v12 = vld [vmem:[#allocation8 + $0x14c] ss:$16 sps:$4 sm:$0xff]  }
  0xb7   :  { %734 = vmatprep.subr.bf16.mxu0 %v2522_v15  ;;  %v2592_v15 = vld [vmem:[#allocation8 + $0x164] ss:$16 sps:$4 sm:$0xff]  }
  0xba   :  { %735 = vmatpush1.bf16.msra.mxu0 %v2520_v16  ;;  %v2595_v16 = vld [vmem:[#allocation8 + $0x16c] ss:$16 sps:$4 sm:$0xff]  }
  0xbb   :  { %1625 = vmatprep.subr.bf16.mxu0 %v2529_v19  ;;  %v2598_v19 = vld [vmem:[#allocation8 + $0x184] ss:$16 sps:$4 sm:$0xff]  }
 0x150   :  { %v246_v27 = vpop.f32.mrb[0].mxu0 }
 0x151   :  { %v247_v28 = vadd.f32 %v246_v27, %v125_v25  ;;  %v248_v29 = vpop.f32.mrb[1].mxu0  ;;  %v2599_v25 = vld [vmem:[#allocation8 + $0x188] ss:$16 sps:$4 sm:$0xff]   ;;  %v2607_v27 = vld [vmem:[#allocation8 + $0x1ac] ss:$16 sps:$4 sm:$0xff]  }
 0x152   :  { %v249_v30 = vadd.f32 %v248_v29, %v129_v26  ;;  %v250_v31 = vpop.f32.mrb[2].mxu0  ;;  %v2604_v26 = vld [vmem:[#allocation8 + $0x1a4] ss:$16 sps:$4 sm:$0xff]   ;;  %v2605_v29 = vld [vmem:[#allocation8 + $0x1a8] ss:$16 sps:$4 sm:$0xff]  }
 0x153   :  { %v253_v32 = vmax.f32 %v247_v28, 0.0  ;;  %v251_v33 = vpop.f32.mrb[3].mxu0  ;;  %v2602_v28 = vld [vmem:[#allocation8 + $0x1a0] ss:$16 sps:$4 sm:$0xff]   ;;  %v2613_v31 = vld [vmem:[#allocation8 + $0x1cc] ss:$16 sps:$4 sm:$0xff]  }
 0x154   :  { %v254_v34 = vmax.f32 %v249_v30, 0.0  ;;  %v2610_v30 = vld [vmem:[#allocation8 + $0x1c4] ss:$16 sps:$4 sm:$0xff]   ;;  %v2611_v33 = vld [vmem:[#allocation8 + $0x1c8] ss:$16 sps:$4 sm:$0xff]  }
 0x155   :  { %v255_v38 = vpack.c.bf16 %v253_v32, %v253_v32  ;;  %v2608_v32 = vld [vmem:[#allocation8 + $0x1c0] ss:$16 sps:$4 sm:$0xff]  }
 0x156   :  { %v256_v35 = vpack.c.bf16 %v254_v34, %v254_v34  ;;  %v2616_v34 = vld [vmem:[#allocation8 + $0x1e4] ss:$16 sps:$4 sm:$0xff]  }
 0x158   :  { %695 = vmatprep.mubr.bf16.mxu1 %v256_v35  ;;  %736 = vmatprep.mubr.bf16.mxu0 %v256_v35  ;;  %v2619_v35 = vld [vmem:[#allocation8 + $0x1ec] ss:$16 sps:$4 sm:$0xff]  }
 0x159   :  { %696 = vmatmul.mubr.bf16.vlgmr.msra.gmra.mrb[0].mxu1 %v255_v38  ;;  %737 = vmatmul.mubr.bf16.vlgmr.msra.gmra.mrb[4].mxu0 %v255_v38  ;;  %v2622_v38 = vld [vmem:[#allocation8 + $0x204] ss:$16 sps:$4 sm:$0xff]  }
 0x15a   :  { %1544 = vmatpush1.bf16.msra.mxu1 %v2524_v36  ;;  %1626 = vmatpush1.bf16.msra.mxu0 %v2527_v37  ;;  %v2614_v36 = vld [vmem:[#allocation8 + $0x1e0] ss:$16 sps:$4 sm:$0xff]   ;;  %v2617_v37 = vld [vmem:[#allocation8 + $0x1e8] ss:$16 sps:$4 sm:$0xff]  }
 0x15b   :  { %1545 = vmatprep.subr.bf16.mxu1 %v2532_v39  ;;  %1627 = vmatprep.subr.bf16.mxu0 %v2535_v40  ;;  %v2625_v39 = vld [vmem:[#allocation8 + $0x20c] ss:$16 sps:$4 sm:$0xff]  }
 0x15c   :  { %v3065_v40 = vld [vmem:[%s3122_s4] sm:$0xf] }
 0x15e   :  { %1546 = vmatpush1.bf16.msra.mxu1 %v2530_v41  ;;  %1628 = vmatpush1.bf16.msra.mxu0 %v2533_v42  ;;  %v337_v41 = vsub.s32 3, %v3049_v21  ;;  %v326_v42 = vrot.slane %v3065_v40, %v3052_v22 }
 0x15f   :  { %1547 = vmatprep.subr.bf16.mxu1 %v2538_v43  ;;  %1629 = vmatprep.subr.bf16.mxu0 %v2541_v44  ;;  %v330_v43 = vrot.slane %v3065_v40, %v3058_v24 }
 0x160   :  { %v338_v44 = vrot.slane %v3065_v40, %v337_v41 }
 0x162   :  { %1548 = vmatpush1.bf16.msra.mxu1 %v2536_v45  ;;  %1630 = vmatpush1.bf16.msra.mxu0 %v2539_v46 }
 0x163   :  { %1549 = vmatprep.subr.bf16.mxu1 %v2544_v47  ;;  %1631 = vmatprep.subr.bf16.mxu0 %v2547_v48 }
 0x166   :  { %1550 = vmatpush1.bf16.msra.mxu1 %v2542_v49  ;;  %1632 = vmatpush1.bf16.msra.mxu0 %v2545_v50 }
 0x167   :  { %1551 = vmatprep.subr.bf16.mxu1 %v2550_v51  ;;  %1633 = vmatprep.subr.bf16.mxu0 %v2553_v52 }
 0x16a   :  { %1552 = vmatpush1.bf16.msra.mxu1 %v2548_v53  ;;  %1634 = vmatpush1.bf16.msra.mxu0 %v2551_v54 }
 0x16b   :  { %1553 = vmatprep.subr.bf16.mxu1 %v2556_v55  ;;  %1635 = vmatprep.subr.bf16.mxu0 %v2559_v56 }
 0x16e   :  { %1554 = vmatpush1.bf16.msra.mxu1 %v2554_v57  ;;  %1636 = vmatpush1.bf16.msra.mxu0 %v2557_v58 }
 0x16f   :  { %1555 = vmatprep.subr.bf16.mxu1 %v2562_v59  ;;  %1637 = vmatprep.subr.bf16.mxu0 %v2565_v60  ;;  %v2620_v60 = vld [vmem:[#allocation8 + $0x200] ss:$16 sps:$4 sm:$0xff]  }
 0x172   :  { %1556 = vmatpush1.bf16.msra.mxu1 %v2560_v61  ;;  %1638 = vmatpush1.bf16.msra.mxu0 %v2563_v62  ;;  %v2623_v61 = vld [vmem:[#allocation8 + $0x208] ss:$16 sps:$4 sm:$0xff]  }
 0x173   :  { %1557 = vmatprep.subr.bf16.mxu1 %v2568_v63  ;;  %1639 = vmatprep.subr.bf16.mxu0 %v2571_v0  ;;  %v2628_v63 = vld [vmem:[#allocation8 + $0x224] ss:$16 sps:$4 sm:$0xff]   ;;  %v2631_v0 = vld [vmem:[#allocation8 + $0x22c] ss:$16 sps:$4 sm:$0xff]  }
 0x176   :  { %1558 = vmatpush1.bf16.msra.mxu1 %v2566_v1  ;;  %1640 = vmatpush1.bf16.msra.mxu0 %v2569_v2  ;;  %v2626_v2 = vld [vmem:[#allocation8 + $0x220] ss:$16 sps:$4 sm:$0xff]  }
 0x177   :  { %1559 = vmatprep.subr.bf16.mxu1 %v2574_v3  ;;  %1641 = vmatprep.subr.bf16.mxu0 %v2577_v4  ;;  %v2629_v3 = vld [vmem:[#allocation8 + $0x228] ss:$16 sps:$4 sm:$0xff]   ;;  %v2634_v4 = vld [vmem:[#allocation8 + $0x244] ss:$16 sps:$4 sm:$0xff]  }
 0x17a   :  { %1560 = vmatpush1.bf16.msra.mxu1 %v2572_v5  ;;  %1642 = vmatpush1.bf16.msra.mxu0 %v2575_v6  ;;  %v2637_v5 = vld [vmem:[#allocation8 + $0x24c] ss:$16 sps:$4 sm:$0xff]   ;;  %v2632_v6 = vld [vmem:[#allocation8 + $0x240] ss:$16 sps:$4 sm:$0xff]  }
 0x17b   :  { %1561 = vmatprep.subr.bf16.mxu1 %v2580_v7  ;;  %1643 = vmatprep.subr.bf16.mxu0 %v2583_v8  ;;  %v2635_v7 = vld [vmem:[#allocation8 + $0x248] ss:$16 sps:$4 sm:$0xff]   ;;  %v2640_v8 = vld [vmem:[#allocation8 + $0x264] ss:$16 sps:$4 sm:$0xff]  }
 0x17e   :  { %1562 = vmatpush1.bf16.msra.mxu1 %v2578_v9  ;;  %1644 = vmatpush1.bf16.msra.mxu0 %v2581_v10  ;;  %v2643_v9 = vld [vmem:[#allocation8 + $0x26c] ss:$16 sps:$4 sm:$0xff]   ;;  %v2638_v10 = vld [vmem:[#allocation8 + $0x260] ss:$16 sps:$4 sm:$0xff]  }
 0x17f   :  { %1563 = vmatprep.subr.bf16.mxu1 %v2586_v11  ;;  %1645 = vmatprep.subr.bf16.mxu0 %v2589_v12  ;;  %v2641_v11 = vld [vmem:[#allocation8 + $0x268] ss:$16 sps:$4 sm:$0xff]   ;;  %v2646_v12 = vld [vmem:[#allocation8 + $0x284] ss:$16 sps:$4 sm:$0xff]  }
 0x182   :  { %1564 = vmatpush1.bf16.msra.mxu1 %v2584_v13  ;;  %1646 = vmatpush1.bf16.msra.mxu0 %v2587_v14  ;;  %v2649_v13 = vld [vmem:[#allocation8 + $0x28c] ss:$16 sps:$4 sm:$0xff]   ;;  %v2644_v14 = vld [vmem:[#allocation8 + $0x280] ss:$16 sps:$4 sm:$0xff]  }
 0x183   :  { %1565 = vmatprep.subr.bf16.mxu1 %v2592_v15  ;;  %1647 = vmatprep.subr.bf16.mxu0 %v2595_v16  ;;  %v2647_v15 = vld [vmem:[#allocation8 + $0x288] ss:$16 sps:$4 sm:$0xff]   ;;  %v2652_v16 = vld [vmem:[#allocation8 + $0x2a4] ss:$16 sps:$4 sm:$0xff]  }
 0x186   :  { %1566 = vmatpush1.bf16.msra.mxu1 %v2590_v17  ;;  %1648 = vmatpush1.bf16.msra.mxu0 %v2593_v18  ;;  %v2655_v17 = vld [vmem:[#allocation8 + $0x2ac] ss:$16 sps:$4 sm:$0xff]   ;;  %v2650_v18 = vld [vmem:[#allocation8 + $0x2a0] ss:$16 sps:$4 sm:$0xff]  }
 0x187   :  { %1567 = vmatprep.subr.bf16.mxu1 %v2598_v19  ;;  %1649 = vmatprep.subr.bf16.mxu0 %v2601_v20  ;;  %v2653_v19 = vld [vmem:[#allocation8 + $0x2a8] ss:$16 sps:$4 sm:$0xff]   ;;  %v2658_v20 = vld [vmem:[#allocation8 + $0x2c4] ss:$16 sps:$4 sm:$0xff]  }
 0x18a   :  { %1568 = vmatpush1.bf16.msra.mxu1 %v2596_v23  ;;  %1650 = vmatpush1.bf16.msra.mxu0 %v2599_v25  ;;  %v2661_v23 = vld [vmem:[#allocation8 + $0x2cc] ss:$16 sps:$4 sm:$0xff]   ;;  %v2656_v25 = vld [vmem:[#allocation8 + $0x2c0] ss:$16 sps:$4 sm:$0xff]  }
 0x18b   :  { %1569 = vmatprep.subr.bf16.mxu1 %v2604_v26  ;;  %1651 = vmatprep.subr.bf16.mxu0 %v2607_v27  ;;  %v2659_v26 = vld [vmem:[#allocation8 + $0x2c8] ss:$16 sps:$4 sm:$0xff]   ;;  %v2664_v27 = vld [vmem:[#allocation8 + $0x2e4] ss:$16 sps:$4 sm:$0xff]  }
 0x18e   :  { %1570 = vmatpush1.bf16.msra.mxu1 %v2602_v28  ;;  %1652 = vmatpush1.bf16.msra.mxu0 %v2605_v29  ;;  %v2667_v28 = vld [vmem:[#allocation8 + $0x2ec] ss:$16 sps:$4 sm:$0xff]   ;;  %v2662_v29 = vld [vmem:[#allocation8 + $0x2e0] ss:$16 sps:$4 sm:$0xff]  }
 0x18f   :  { %1571 = vmatprep.subr.bf16.mxu1 %v2610_v30  ;;  %1653 = vmatprep.subr.bf16.mxu0 %v2613_v31  ;;  %v2665_v30 = vld [vmem:[#allocation8 + $0x2e8] ss:$16 sps:$4 sm:$0xff]   ;;  %v2670_v31 = vld [vmem:[#allocation8 + $0x304] ss:$16 sps:$4 sm:$0xff]  }
 0x192   :  { %1572 = vmatpush1.bf16.msra.mxu1 %v2608_v32  ;;  %1654 = vmatpush1.bf16.msra.mxu0 %v2611_v33  ;;  %v2673_v32 = vld [vmem:[#allocation8 + $0x30c] ss:$16 sps:$4 sm:$0xff]   ;;  %v2668_v33 = vld [vmem:[#allocation8 + $0x300] ss:$16 sps:$4 sm:$0xff]  }
 0x193   :  { %1573 = vmatprep.subr.bf16.mxu1 %v2616_v34  ;;  %1655 = vmatprep.subr.bf16.mxu0 %v2619_v35  ;;  %v2671_v34 = vld [vmem:[#allocation8 + $0x308] ss:$16 sps:$4 sm:$0xff]   ;;  %v2676_v35 = vld [vmem:[#allocation8 + $0x324] ss:$16 sps:$4 sm:$0xff]  }
 0x196   :  { %1574 = vmatpush1.bf16.msra.mxu1 %v2614_v36  ;;  %1656 = vmatpush1.bf16.msra.mxu0 %v2617_v37  ;;  %v2679_v36 = vld [vmem:[#allocation8 + $0x32c] ss:$16 sps:$4 sm:$0xff]   ;;  %v2674_v37 = vld [vmem:[#allocation8 + $0x320] ss:$16 sps:$4 sm:$0xff]  }
 0x197   :  { %1584 = vmatprep.subr.bf16.mxu1 %v2622_v38  ;;  %1666 = vmatprep.subr.bf16.mxu0 %v2625_v39  ;;  %v2677_v38 = vld [vmem:[#allocation8 + $0x328] ss:$16 sps:$4 sm:$0xff]   ;;  %v2682_v39 = vld [vmem:[#allocation8 + $0x344] ss:$16 sps:$4 sm:$0xff]  }
 0x22c   :  { %v697_v45 = vpop.f32.mrb[0].mxu1  ;;  %v3075_v46 = vpop.f32.mrb[4].mxu0 }
 0x22d   :  { %v698_v47 = vadd.f32 %v697_v45, %v326_v42  ;;  %v699_v48 = vpop.f32.mrb[1].mxu1  ;;  %v740_v49 = vpop.f32.mrb[5].mxu0  ;;  %v2685_v42 = vld [vmem:[#allocation8 + $0x34c] ss:$16 sps:$4 sm:$0xff]   ;;  %v2688_v45 = vld [vmem:[#allocation8 + $0x364] ss:$16 sps:$4 sm:$0xff]  }
 0x22e   :  { %v700_v50 = vadd.f32 %v699_v48, %v330_v43  ;;  %v741_v51 = vadd.f32 %v740_v49, %v338_v44  ;;  %v701_v52 = vpop.f32.mrb[2].mxu1  ;;  %v742_v53 = vpop.f32.mrb[6].mxu0  ;;  %v2680_v43 = vld [vmem:[#allocation8 + $0x340] ss:$16 sps:$4 sm:$0xff]   ;;  %v2683_v44 = vld [vmem:[#allocation8 + $0x348] ss:$16 sps:$4 sm:$0xff]  }
 0x22f   :  { %v745_v54 = vmax.f32 %v698_v47, 0.0  ;;  %v702_v55 = vpop.f32.mrb[3].mxu1  ;;  %v743_v56 = vpop.f32.mrb[7].mxu0  ;;  %v2691_v47 = vld [vmem:[#allocation8 + $0x36c] ss:$16 sps:$4 sm:$0xff]  }
 0x230   :  { %v746_v57 = vmax.f32 %v700_v50, 0.0  ;;  %v748_v58 = vmax.f32 %v741_v51, 0.0  ;;  %v2686_v48 = vld [vmem:[#allocation8 + $0x360] ss:$16 sps:$4 sm:$0xff]   ;;  %v2689_v49 = vld [vmem:[#allocation8 + $0x368] ss:$16 sps:$4 sm:$0xff]  }
 0x231   :  { %v749_v62 = vpack.c.bf16 %v745_v54, %v745_v54  ;;  %v2694_v50 = vld [vmem:[#allocation8 + $0x384] ss:$16 sps:$4 sm:$0xff]   ;;  %v2697_v51 = vld [vmem:[#allocation8 + $0x38c] ss:$16 sps:$4 sm:$0xff]   ;;  %v2692_v52 = vld [vmem:[#allocation8 + $0x380] ss:$16 sps:$4 sm:$0xff]  }
 0x232   :  { %v750_v59 = vpack.c.bf16 %v746_v57, %v746_v57  ;;  %v752_v1 = vpack.c.bf16 %v748_v58, %v748_v58  ;;  %v2695_v53 = vld [vmem:[#allocation8 + $0x388] ss:$16 sps:$4 sm:$0xff]   ;;  %v333_v54 = vsub.s32 2, %v3049_v21  ;;  %v2700_v55 = vld [vmem:[#allocation8 + $0x3a4] ss:$16 sps:$4 sm:$0xff]  }
 0x233   :  { %v2703_v56 = vld [vmem:[#allocation8 + $0x3ac] ss:$16 sps:$4 sm:$0xff]   ;;  %v2698_v57 = vld [vmem:[#allocation8 + $0x3a0] ss:$16 sps:$4 sm:$0xff]   ;;  %v2701_v58 = vld [vmem:[#allocation8 + $0x3a8] ss:$16 sps:$4 sm:$0xff]  }
 0x234   :  { %1575 = vmatprep.mubr.bf16.mxu1 %v750_v59  ;;  %1657 = vmatprep.mubr.bf16.mxu0 %v750_v59  ;;  %v334_v59 = vrot.slane %v3065_v40, %v333_v54  ;;  %v2716_v40 = vld [vmem:[#allocation10 + $0x40] sm:$0xff]  }
 0x235   :  { %1576 = vmatmul.mubr.bf16.vlgmr.msra.gmra.mrb[4].mxu1 %v749_v62  ;;  %1658 = vmatmul.mubr.bf16.vlgmr.msra.gmra.mrb[8].mxu0 %v749_v62  ;;  %v2704_v62 = vld [vmem:[#allocation8 + $0x3c0] ss:$16 sps:$4 sm:$0xff]  }
 0x236   :  { %1585 = vmatpush1.bf16.msra.mxu1 %v2620_v60  ;;  %1667 = vmatpush1.bf16.msra.mxu0 %v2623_v61  ;;  %v2706_v60 = vld [vmem:[#allocation8 + $0x3c4] ss:$16 sps:$4 sm:$0xff]   ;;  %v2709_v61 = vld [vmem:[#allocation8 + $0x3cc] ss:$16 sps:$4 sm:$0xff]  }
 0x237   :  { %1616 = vmatprep.mubr.bf16.mxu1 %v752_v1  ;;  %1698 = vmatprep.mubr.bf16.mxu0 %v752_v1  ;;  %v2712_v1 = vld [vmem:[#allocation8 + $0x3e4] ss:$16 sps:$4 sm:$0xff]  }
 0x238   :  { %1586 = vmatprep.subr.bf16.mxu1 %v2628_v63  ;;  %1668 = vmatprep.subr.bf16.mxu0 %v2631_v0  ;;  %v2707_v63 = vld [vmem:[#allocation8 + $0x3c8] ss:$16 sps:$4 sm:$0xff]   ;;  %v739_v0 = vadd.f32 %v3075_v46, %v334_v59 }
 0x239   :  { %v2720_v46 = vld [vmem:[#allocation10 + $0x48] sm:$0xff]  }
 0x23a   :  { %1587 = vmatpush1.bf16.msra.mxu1 %v2626_v2  ;;  %1669 = vmatpush1.bf16.msra.mxu0 %v2629_v3  ;;  %v2715_v2 = vld [vmem:[#allocation8 + $0x3ec] ss:$16 sps:$4 sm:$0xff]   ;;  %v2710_v3 = vld [vmem:[#allocation8 + $0x3e0] ss:$16 sps:$4 sm:$0xff]  }
 0x23b   :  { %1588 = vmatprep.subr.bf16.mxu1 %v2634_v4  ;;  %1670 = vmatprep.subr.bf16.mxu0 %v2637_v5  ;;  %v2713_v4 = vld [vmem:[#allocation8 + $0x3e8] ss:$16 sps:$4 sm:$0xff]   ;;  %v747_v5 = vmax.f32 %v739_v0, 0.0 }
 0x23e   :  { %1589 = vmatpush1.bf16.msra.mxu1 %v2632_v6  ;;  %1671 = vmatpush1.bf16.msra.mxu0 %v2635_v7  ;;  %v2717_v6 = vld [vmem:[#allocation10 + $0xc0] sm:$0xff]  }
 0x23f   :  { %1590 = vmatprep.subr.bf16.mxu1 %v2640_v8  ;;  %1672 = vmatprep.subr.bf16.mxu0 %v2643_v9  ;;  %v2718_v7 = vld [vmem:[#allocation10] sm:$0xff]   ;;  %v751_v9 = vpack.c.bf16 %v747_v5, %v747_v5 }
 0x240   :  { %v2719_v8 = vld [vmem:[#allocation10 + $0x80] sm:$0xff]  }
 0x242   :  { %1591 = vmatpush1.bf16.msra.mxu1 %v2638_v10  ;;  %1673 = vmatpush1.bf16.msra.mxu0 %v2641_v11  ;;  %v2721_v10 = vld [vmem:[#allocation10 + $0xc8] sm:$0xff]  }
 0x243   :  { %1592 = vmatprep.subr.bf16.mxu1 %v2646_v12  ;;  %1674 = vmatprep.subr.bf16.mxu0 %v2649_v13  ;;  %v2722_v11 = vld [vmem:[#allocation10 + $0x8] sm:$0xff]   ;;  %v2724_v13 = vld [vmem:[#allocation10 + $0x50] sm:$0xff]  }
 0x244   :  { %v2723_v12 = vld [vmem:[#allocation10 + $0x88] sm:$0xff]  }
 0x246   :  { %1593 = vmatpush1.bf16.msra.mxu1 %v2644_v14  ;;  %1675 = vmatpush1.bf16.msra.mxu0 %v2647_v15  ;;  %v2725_v14 = vld [vmem:[#allocation10 + $0xd0] sm:$0xff]  }
 0x247   :  { %1594 = vmatprep.subr.bf16.mxu1 %v2652_v16  ;;  %1676 = vmatprep.subr.bf16.mxu0 %v2655_v17  ;;  %v2726_v15 = vld [vmem:[#allocation10 + $0x10] sm:$0xff]   ;;  %v2728_v17 = vld [vmem:[#allocation10 + $0x58] sm:$0xff]  }
 0x248   :  { %v2727_v16 = vld [vmem:[#allocation10 + $0x90] sm:$0xff]  }
 0x24a   :  { %1595 = vmatpush1.bf16.msra.mxu1 %v2650_v18  ;;  %1677 = vmatpush1.bf16.msra.mxu0 %v2653_v19  ;;  %v2729_v18 = vld [vmem:[#allocation10 + $0xd8] sm:$0xff]  }
 0x24b   :  { %1596 = vmatprep.subr.bf16.mxu1 %v2658_v20  ;;  %1678 = vmatprep.subr.bf16.mxu0 %v2661_v23  ;;  %v2730_v19 = vld [vmem:[#allocation10 + $0x18] sm:$0xff]   ;;  %v2732_v23 = vld [vmem:[#allocation10 + $0x60] sm:$0xff]  }
 0x24c   :  { %v2731_v20 = vld [vmem:[#allocation10 + $0x98] sm:$0xff]  }
 0x24e   :  { %1597 = vmatpush1.bf16.msra.mxu1 %v2656_v25  ;;  %1679 = vmatpush1.bf16.msra.mxu0 %v2659_v26  ;;  %v2733_v25 = vld [vmem:[#allocation10 + $0xe0] sm:$0xff]  }
 0x24f   :  { %1598 = vmatprep.subr.bf16.mxu1 %v2664_v27  ;;  %1680 = vmatprep.subr.bf16.mxu0 %v2667_v28  ;;  %v2734_v26 = vld [vmem:[#allocation10 + $0x20] sm:$0xff]   ;;  %v2736_v28 = vld [vmem:[#allocation10 + $0x68] sm:$0xff]  }
 0x250   :  { %v2735_v27 = vld [vmem:[#allocation10 + $0xa0] sm:$0xff]  }
 0x252   :  { %1599 = vmatpush1.bf16.msra.mxu1 %v2662_v29  ;;  %1681 = vmatpush1.bf16.msra.mxu0 %v2665_v30  ;;  %v2737_v29 = vld [vmem:[#allocation10 + $0xe8] sm:$0xff]  }
 0x253   :  { %1600 = vmatprep.subr.bf16.mxu1 %v2670_v31  ;;  %1682 = vmatprep.subr.bf16.mxu0 %v2673_v32  ;;  %v2738_v30 = vld [vmem:[#allocation10 + $0x28] sm:$0xff]   ;;  %v2740_v32 = vld [vmem:[#allocation10 + $0x70] sm:$0xff]  }
 0x254   :  { %v2739_v31 = vld [vmem:[#allocation10 + $0xa8] sm:$0xff]  }
 0x256   :  { %1601 = vmatpush1.bf16.msra.mxu1 %v2668_v33  ;;  %1683 = vmatpush1.bf16.msra.mxu0 %v2671_v34  ;;  %v2741_v33 = vld [vmem:[#allocation10 + $0xf0] sm:$0xff]  }
 0x257   :  { %1602 = vmatprep.subr.bf16.mxu1 %v2676_v35  ;;  %1684 = vmatprep.subr.bf16.mxu0 %v2679_v36  ;;  %v2742_v34 = vld [vmem:[#allocation10 + $0x30] sm:$0xff]   ;;  %v2744_v36 = vld [vmem:[#allocation10 + $0x78] sm:$0xff]  }
 0x258   :  { %v2743_v35 = vld [vmem:[#allocation10 + $0xb0] sm:$0xff]  }
 0x25a   :  { %1603 = vmatpush1.bf16.msra.mxu1 %v2674_v37  ;;  %1685 = vmatpush1.bf16.msra.mxu0 %v2677_v38  ;;  %v2745_v37 = vld [vmem:[#allocation10 + $0xf8] sm:$0xff]  }
 0x25b   :  { %1604 = vmatprep.subr.bf16.mxu1 %v2682_v39  ;;  %1686 = vmatprep.subr.bf16.mxu0 %v2685_v42  ;;  %v2746_v38 = vld [vmem:[#allocation10 + $0x38] sm:$0xff]  }
 0x25c   :  { %v2747_v39 = vld [vmem:[#allocation10 + $0xb8] sm:$0xff]  }
 0x25d   :  { %v881_v42 = vld [vmem:[%s3124_s6] sm:$0xf] }
 0x25e   :  { %1605 = vmatpush1.bf16.msra.mxu1 %v2680_v43  ;;  %1687 = vmatpush1.bf16.msra.mxu0 %v2683_v44  ;;  %v886_v43 = vrot.slane %v881_v42, %v3052_v22  ;;  %v894_v44 = vrot.slane %v881_v42, %v333_v54 }
 0x25f   :  { %1606 = vmatprep.subr.bf16.mxu1 %v2688_v45  ;;  %1688 = vmatprep.subr.bf16.mxu0 %v2691_v47  ;;  %v890_v45 = vrot.slane %v881_v42, %v3058_v24  ;;  %v898_v47 = vrot.slane %v881_v42, %v337_v41 }
 0x262   :  { %1607 = vmatpush1.bf16.msra.mxu1 %v2686_v48  ;;  %1689 = vmatpush1.bf16.msra.mxu0 %v2689_v49 }
 0x263   :  { %1608 = vmatprep.subr.bf16.mxu1 %v2694_v50  ;;  %1690 = vmatprep.subr.bf16.mxu0 %v2697_v51 }
 0x266   :  { %1609 = vmatpush1.bf16.msra.mxu1 %v2692_v52  ;;  %1691 = vmatpush1.bf16.msra.mxu0 %v2695_v53 }
 0x267   :  { %1610 = vmatprep.subr.bf16.mxu1 %v2700_v55  ;;  %1692 = vmatprep.subr.bf16.mxu0 %v2703_v56 }
 0x26a   :  { %1611 = vmatpush1.bf16.msra.mxu1 %v2698_v57  ;;  %1693 = vmatpush1.bf16.msra.mxu0 %v2701_v58 }
 0x26b   :  { %1612 = vmatprep.subr.bf16.mxu1 %v2706_v60  ;;  %1694 = vmatprep.subr.bf16.mxu0 %v2709_v61 }
 0x26e   :  { %1613 = vmatpush1.bf16.msra.mxu1 %v2704_v62  ;;  %1695 = vmatpush1.bf16.msra.mxu0 %v2707_v63 }
 0x26f   :  { %1614 = vmatprep.subr.bf16.mxu1 %v2712_v1  ;;  %1696 = vmatprep.subr.bf16.mxu0 %v2715_v2  ;;  %v2301_v2 = vld [vmem:[%s3126_s8] ss:$0 sm:$0xff]  ;;  %s2860_s8 = scalar_lea.vmem %s2079_s20, 128 }
 0x270   :  { %p2861_p12 = scmp.ne.s32.totalorder %s2079_s20, %s2860_s8  ;;  %p2866_p0 = scmp.lt.s32.totalorder %s2860_s8, %s2860_s8 }
 0x272   :  { %1615 = vmatpush1.bf16.msra.mxu1 %v2710_v3  ;;  %1697 = vmatpush1.bf16.msra.mxu0 %v2713_v4  ;;  %p2867_p1 = por %p2866_p0, %p2865_p13 }
 0x273   :  { %2334 = vmatprep.subr.bf16.mxu1 %v2716_v40  ;;  %2356 = vmatprep.subr.bf16.mxu0 %v2717_v6 }
 0x274   :  { %p2868_p2 = pnand %p2867_p1, %p2861_p12 }
 0x275   :  { %1617 = vmatmul.mubr.bf16.vlgmr.msra.gmra.mrb[4].mxu1 %v751_v9  ;;  %1699 = vmatmul.mubr.bf16.vlgmr.msra.gmra.mrb[8].mxu0 %v751_v9 }
 0x276   :  { %2335 = vmatpush3.bf16.msra.mxu1 %v2718_v7  ;;  %2357 = vmatpush3.bf16.msra.mxu0 %v2719_v8 }
 0x277   :  { %2336 = vmatprep.subr.bf16.mxu1 %v2720_v46  ;;  %2358 = vmatprep.subr.bf16.mxu0 %v2721_v10 }
 0x27a   :  { %2337 = vmatpush3.bf16.msra.mxu1 %v2722_v11  ;;  %2359 = vmatpush3.bf16.msra.mxu0 %v2723_v12 }
 0x27b   :  { %2338 = vmatprep.subr.bf16.mxu1 %v2724_v13  ;;  %2360 = vmatprep.subr.bf16.mxu0 %v2725_v14 }
 0x27e   :  { %2339 = vmatpush3.bf16.msra.mxu1 %v2726_v15  ;;  %2361 = vmatpush3.bf16.msra.mxu0 %v2727_v16 }
 0x27f   :  { %2340 = vmatprep.subr.bf16.mxu1 %v2728_v17  ;;  %2362 = vmatprep.subr.bf16.mxu0 %v2729_v18 }
 0x282   :  { %2341 = vmatpush3.bf16.msra.mxu1 %v2730_v19  ;;  %2363 = vmatpush3.bf16.msra.mxu0 %v2731_v20 }
 0x283   :  { %2342 = vmatprep.subr.bf16.mxu1 %v2732_v23  ;;  %2364 = vmatprep.subr.bf16.mxu0 %v2733_v25 }
 0x286   :  { %2343 = vmatpush3.bf16.msra.mxu1 %v2734_v26  ;;  %2365 = vmatpush3.bf16.msra.mxu0 %v2735_v27 }
 0x287   :  { %2344 = vmatprep.subr.bf16.mxu1 %v2736_v28  ;;  %2366 = vmatprep.subr.bf16.mxu0 %v2737_v29 }
 0x28a   :  { %2345 = vmatpush3.bf16.msra.mxu1 %v2738_v30  ;;  %2367 = vmatpush3.bf16.msra.mxu0 %v2739_v31 }
 0x28b   :  { %2346 = vmatprep.subr.bf16.mxu1 %v2740_v32  ;;  %2368 = vmatprep.subr.bf16.mxu0 %v2741_v33 }
 0x28e   :  { %2347 = vmatpush3.bf16.msra.mxu1 %v2742_v34  ;;  %2369 = vmatpush3.bf16.msra.mxu0 %v2743_v35 }
 0x28f   :  { %2348 = vmatprep.subr.bf16.mxu1 %v2744_v36  ;;  %2370 = vmatprep.subr.bf16.mxu0 %v2745_v37 }
 0x292   :  { %2349 = vmatpush3.bf16.msra.mxu1 %v2746_v38  ;;  %2371 = vmatpush3.bf16.msra.mxu0 %v2747_v39 }
 0x348   :  { %v1618_v48 = vpop.f32.mrb[4].mxu1  ;;  %v1700_v49 = vpop.f32.mrb[8].mxu0 }
 0x349   :  { %v2378_v50 = vadd.f32 %v1618_v48, %v886_v43  ;;  %v2380_v51 = vadd.f32 %v1700_v49, %v894_v44  ;;  %v1620_v52 = vpop.f32.mrb[5].mxu1  ;;  %v1702_v53 = vpop.f32.mrb[9].mxu0 }
 0x34a   :  { %v2379_v55 = vadd.f32 %v1620_v52, %v890_v45  ;;  %v2381_v56 = vadd.f32 %v1702_v53, %v898_v47  ;;  %v1622_v57 = vpop.f32.mrb[6].mxu1  ;;  %v1704_v58 = vpop.f32.mrb[10].mxu0 }
 0x34b   :  { %v1707_v59 = vmax.f32 %v2378_v50, 0.0  ;;  %v1709_v22 = vmax.f32 %v2380_v51, 0.0  ;;  %v1623_v60 = vpop.f32.mrb[7].mxu1  ;;  %v1705_v61 = vpop.f32.mrb[11].mxu0 }
 0x34c   :  { %v1708_v54 = vmax.f32 %v2379_v55, 0.0  ;;  %v1710_v62 = vmax.f32 %v2381_v56, 0.0 }
 0x34d   :  { %v1711_v21 = vpack.c.bf16 %v1707_v59, %v1707_v59  ;;  %v1713_v41 = vpack.c.bf16 %v1709_v22, %v1709_v22 }
 0x34e   :  { %v1712_v24 = vpack.c.bf16 %v1708_v54, %v1708_v54  ;;  %v1714_v63 = vpack.c.bf16 %v1710_v62, %v1710_v62 }
 0x350   :  { %2010 = vmatprep.mubr.bf16.mxu1 %v1712_v24  ;;  %2050 = vmatprep.mubr.bf16.mxu0 %v1714_v63 }
 0x351   :  { %2011 = vmatmul.mubr.bf16.vlgmr.msra.gmra.mrb[8].mxu1 %v1711_v21  ;;  %2051 = vmatmul.mubr.bf16.vlgmr.msra.gmra.mrb[12].mxu0 %v1713_v41 }
 0x424   :  { %v2350_v0 = vpop.f32.mrb[8].mxu1  ;;  %v2372_v1 = vpop.f32.mrb[12].mxu0 }
 0x425   :  { %v2351_v3 = vpop.f32.mrb[9].mxu1  ;;  %v2373_v4 = vpop.f32.mrb[13].mxu0 }
 0x426   :  { %v2352_v5 = vadd.f32 %v2351_v3, %v2350_v0  ;;  %v2374_v40 = vadd.f32 %v2373_v4, %v2372_v1  ;;  %v2353_v6 = vpop.f32.mrb[10].mxu1  ;;  %v2375_v7 = vpop.f32.mrb[14].mxu0 }
 0x427   :  { %v2354_v8 = vpop.f32.mrb[11].mxu1  ;;  %v2376_v9 = vpop.f32.mrb[15].mxu0 }
 0x428   :  { %v2013_v46 = vadd.f32 %v2352_v5, %v2301_v2 }
 0x42a   :  { %v2053_v10 = vadd.f32 %v2374_v40, %v2013_v46 }
 0x42c   :  { %2748 = vtanh.f32 %v2053_v10 }
 0x436   :  { %v2749_v11 = vpop.eup %2748 }
 0x437   :  { %2059 = vst [vmem:[#allocation12] sm:$0xff] %v2749_v11  ;;  %v2060_v12 = vmul.f32 2.0, %v2749_v11 }
 0x438   :  { %2871 = shalt.err (!%p2868_p2)
}
 0x439   :  { %s2872_s30 = scalar_lea.hbm %s3128_s10, 128 }
 0x43a   :  { %p2873_p3 = scmp.ne.s32.totalorder %s3128_s10, %s2872_s30  ;;  %p2876_p4 = scmp.lt.u32.totalorder %s2872_s30, %s3128_s10 }
 0x43c   :  { %p2878_p5 = pnand %p2876_p4, %p2873_p3 }
 0x43e   :  { %2881 = shalt.err (!%p2878_p5)
}
 0x43f   :  { %2081 = dma.vmem_to_hbm [thread:$0]  %s2079_s20, 128, %s3128_s10, [#allocation13]   ;;  %2061 = vst [vmem:[#allocation11] sm:$0xff] %v2060_v12 }
 0x440   :  { %s2882_s5 = scalar_lea.vmem %s2069_s22, 128  ;;  %p2887_p7 = scmp.lt.s32.totalorder %s2069_s22, %s2069_s22 }
 0x441   :  { %p2883_p6 = scmp.ne.s32.totalorder %s2069_s22, %s2882_s5  ;;  %p2888_p8 = scmp.lt.s32.totalorder %s2882_s5, %s2882_s5 }
 0x443   :  { %p2889_p9 = por %p2888_p8, %p2887_p7 }
 0x445   :  { %p2890_p10 = pnand %p2889_p9, %p2883_p6 }
 0x447   :  { %2893 = shalt.err (!%p2890_p10)
}
 0x448   :  { %s2894_s3 = scalar_lea.hbm %s3127_s9, 128 }
 0x449   :  { %p2895_p11 = scmp.ne.s32.totalorder %s3127_s9, %s2894_s3  ;;  %p2898_p12 = scmp.lt.u32.totalorder %s2894_s3, %s3127_s9 }
 0x44b   :  { %p2900_p13 = pnand %p2898_p12, %p2895_p11 }
 0x44d   :  { %2903 = shalt.err (!%p2900_p13)
}
 0x44e   :  { %2071 = dma.vmem_to_hbm [thread:$0]  %s2069_s22, 128, %s3127_s9, [#allocation4]  }
 0x44f   :  { %2910 = dma.done.wait [#allocation4], 128  }
 0x450   :  { %2911 = vsyncadd [#allocation4], 4294967168 }
 0x451   :  { %2912 = dma.done.wait [#allocation13], 128  }
 0x452   :  { %2913 = vsyncadd [#allocation13], 4294967168 }
 0x453   :  { %2088 = vsyncpa [#allocation3], 1 }
 0x454   :  { %2089 = vsyncpa [#allocation6], 1 }
 0x455   :  { %2090 = vsyncpa [#allocation9], 1 }
 0x456   :  { %2091 = vsyncpa [#allocation4], 1 }
 0x457   :  { %2092 = vsyncpa [#allocation13], 1 }

</bundles_post_ra>
